<compile_context>
chip_gen: v7x
topology: tpu7x:2x2x1
jax: 0.10.0
libtpu: 0.0.40
codegen_flags: <defaults>
</compile_context>

<pallas_src>
import functools

import jax
import jax.numpy as jnp
from jax.experimental import pallas as pl
from jax.experimental.pallas import tpu as pltpu


# --------------------------------------------------------------------------
# Kernel 1: full class axis resident per row tile (small / moderate C).
# --------------------------------------------------------------------------
def _align_kl_kernel(l1_ref, l2_ref, out_ref, *, inv_t, batch, tile_rows,
                     tiles_per_core, num_row_tiles, has_row_pad):
    c = pl.program_id(0)   # core shard ('parallel')
    i = pl.program_id(1)   # batch tile within shard ('arbitrary', reduction)

    # Output block is resident across the reduction axis -> accumulator.
    @pl.when(i == 0)
    def _init():
        out_ref[...] = jnp.zeros_like(out_ref)

    x1 = l1_ref[...].astype(jnp.float32)
    x2 = l2_ref[...].astype(jnp.float32)
    if inv_t != 1.0:                      # statically skipped when T == 1
        x1 = x1 * inv_t
        x2 = x2 * inv_t

    # kl_row = sum(p2*(log p2 - log p1))
    #        = sum(e2 * d) / S2 + log(S1) - log(S2),  d = (x2-x1) + (m1-m2)
    # Ordered to keep peak live temporaries to ~3 tile-sized f32 values.
    m1 = jnp.max(x1, axis=-1, keepdims=True)
    m2 = jnp.max(x2, axis=-1, keepdims=True)
    d = (x2 - x1) + (m1 - m2)                                     # z2 - z1
    s1 = jnp.sum(jnp.exp(x1 - m1), axis=-1, keepdims=True)        # x1 dies
    e2 = jnp.exp(x2 - m2)                                         # x2 dies
    s2 = jnp.sum(e2, axis=-1, keepdims=True)
    num = jnp.sum(e2 * d, axis=-1, keepdims=True)                 # e2, d die
    kl_row = num / s2 + (jnp.log(s1) - jnp.log(s2))               # (TB, 1)

    if has_row_pad:
        # Only the last real tile and phantom tiles contain padded rows; gate
        # the iota/compare/select there so full tiles pay nothing.
        tile_idx = c * tiles_per_core + i
        needs_mask = tile_idx >= num_row_tiles - 1

        @pl.when(needs_mask)
        def _masked():
            row_ids = (jax.lax.broadcasted_iota(jnp.int32, kl_row.shape, 0)
                       + tile_idx * tile_rows)
            out_ref[...] += jnp.sum(jnp.where(row_ids < batch, kl_row, 0.0))

        @pl.when(jnp.logical_not(needs_mask))
        def _full():
            out_ref[...] += jnp.sum(kl_row)
    else:
        out_ref[...] += jnp.sum(kl_row)


# --------------------------------------------------------------------------
# Kernel 2: class-tiled with online (flash-style) max / log-sum-exp (large C).
# --------------------------------------------------------------------------
def _align_kl_kernel_ct(l1_ref, l2_ref, out_ref, m1_s, s1_s, m2_s, s2_s, num_s,
                        *, inv_t, batch, classes, tile_rows, tile_cols,
                        tiles_per_core, has_row_pad, has_col_pad):
    c = pl.program_id(0)   # core shard ('parallel')
    i = pl.program_id(1)   # batch tile within shard ('arbitrary')
    j = pl.program_id(2)   # class chunk ('arbitrary', innermost)

    @pl.when(jnp.logical_and(i == 0, j == 0))
    def _init_out():
        out_ref[...] = jnp.zeros_like(out_ref)

    @pl.when(j == 0)
    def _init_stats():
        m1_s[...] = jnp.full_like(m1_s, -jnp.inf)
        m2_s[...] = jnp.full_like(m2_s, -jnp.inf)
        s1_s[...] = jnp.zeros_like(s1_s)
        s2_s[...] = jnp.zeros_like(s2_s)
        num_s[...] = jnp.zeros_like(num_s)

    x1 = l1_ref[...].astype(jnp.float32)
    x2 = l2_ref[...].astype(jnp.float32)
    if inv_t != 1.0:
        x1 = x1 * inv_t
        x2 = x2 * inv_t

    if has_col_pad:
        # Padded class columns (last partial chunk): large-negative *finite*
        # sentinel -> exp underflows to exactly 0 and (x2 - x1) == 0 there,
        # so no NaN/Inf can leak into the running statistics.
        col_ids = (jax.lax.broadcasted_iota(jnp.int32, x1.shape, 1)
                   + j * tile_cols)
        valid = col_ids < classes
        x1 = jnp.where(valid, x1, -1e30)
        x2 = jnp.where(valid, x2, -1e30)

    # Online log-sum-exp of stream 1 (only its normalizer is needed).
    m1_new = jnp.maximum(m1_s[...], jnp.max(x1, axis=-1, keepdims=True))
    a1 = jnp.exp(m1_s[...] - m1_new)
    s1_s[...] = a1 * s1_s[...] + jnp.sum(jnp.exp(x1 - m1_new), axis=-1,
                                         keepdims=True)
    m1_s[...] = m1_new

    # Online softmax statistics + cross term for stream 2.
    m2_new = jnp.maximum(m2_s[...], jnp.max(x2, axis=-1, keepdims=True))
    a2 = jnp.exp(m2_s[...] - m2_new)
    e2 = jnp.exp(x2 - m2_new)
    s2_s[...] = a2 * s2_s[...] + jnp.sum(e2, axis=-1, keepdims=True)
    num_s[...] = a2 * num_s[...] + jnp.sum(e2 * (x2 - x1), axis=-1,
                                           keepdims=True)
    m2_s[...] = m2_new

    @pl.when(j == pl.num_programs(2) - 1)
    def _finalize():
        # kl_row = N/S2 + (m1 + log S1) - (m2 + log S2)
        kl_row = (num_s[...] / s2_s[...]
                  + (m1_s[...] - m2_s[...])
                  + jnp.log(s1_s[...]) - jnp.log(s2_s[...]))
        if has_row_pad:
            tile_idx = c * tiles_per_core + i          # UNCLAMPED index
            row_ids = (jax.lax.broadcasted_iota(jnp.int32, kl_row.shape, 0)
                       + tile_idx * tile_rows)
            kl_row = jnp.where(row_ids < batch, kl_row, 0.0)
        out_ref[...] += jnp.sum(kl_row)


# --------------------------------------------------------------------------
# Wrapper
# --------------------------------------------------------------------------
def align_kl_loss(logits1, logits2, temperature: float = 1.0,
                  block_rows=None, block_cols=None):
    """Pallas implementation of AlignKLLoss.forward (reduction='batchmean')."""
    assert logits1.shape == logits2.shape and logits1.ndim == 2
    B, C = logits1.shape
    T = float(temperature)
    itemsize = max(jnp.dtype(logits1.dtype).itemsize,
                   jnp.dtype(logits2.dtype).itemsize)

    # --- per-generation VMEM budget (v7x: 64 MiB/TC, v5e/v6e: 128 MiB) ------
    try:
        vmem_cap = int(pltpu.get_tpu_info().vmem_capacity_bytes)
    except Exception:
        vmem_cap = 64 * 1024 * 1024          # conservative (v7x per-TC)
    vmem_limit = int(min((vmem_cap * 3) // 4, 96 * 1024 * 1024))

    # Per-step footprint: 2 inputs x 2 pipeline buffers (input dtype) plus ~3
    # tile-sized f32 live body temporaries, plus slack for accumulators/scratch.
    slack = 2 * 1024 * 1024
    per_step = lambda rows, cols: rows * cols * (4 * itemsize + 12) + slack

    # --- row (batch) tile ----------------------------------------------------
    if block_rows is not None:
        tb = min(int(block_rows), B)
    else:
        # ~4 MiB of INPUT bytes per tile (dtype-aware: bf16 gets 2x the rows).
        target_elems = (4 * 1024 * 1024) // itemsize
        tb = min(B, max(16, (target_elems // max(C, 1)) // 16 * 16))
    if tb < B:
        # multiple of 16 satisfies both f32 (8,128) and bf16 (16,128) tiling.
        assert tb % 16 == 0, "row tile must be a multiple of 16 when tiling the batch"

    # --- class tile: only when a full-C row slab cannot fit in VMEM ----------
    if block_cols is not None:
        tc = min(int(block_cols), C)
    elif per_step(tb, C) <= vmem_limit:
        tc = C
    else:
        # Shrink rows first (down to 16), then tile the class axis.
        while tb > 16 and per_step(tb, C) > vmem_limit:
            tb = max(16, ((tb // 2) // 16) * 16)
        if per_step(tb, C) <= vmem_limit:
            tc = C
        else:
            tc = ((vmem_limit - slack) // (tb * (4 * itemsize + 12))) // 128 * 128
            tc = min(max(128, tc), C)
    if tc < C:
        assert tc % 128 == 0, "class tile must be a multiple of 128 when tiling classes"

    num_row_tiles = -(-B // tb)
    # Always shard row tiles over two cores when there is more than one tile
    # (v7x megacore; a near-free serial loop on single-TC v5e/v6e).  Odd tile
    # counts use a clamped index map + row mask so the phantom tile adds 0.
    nc = 2 if num_row_tiles >= 2 else 1
    tiles_per_core = -(-num_row_tiles // nc)
    has_row_pad = (nc * tiles_per_core * tb) != B

    # TODO(synk): switch the leading axis to pltpu.CORE_PARALLEL if a v7x
    # profile shows only one TensorCore active with plain "parallel".
    if tc == C:
        dim_sem = ("parallel", "arbitrary")
    else:
        dim_sem = ("parallel", "arbitrary", "arbitrary")
    compiler_params = pltpu.CompilerParams(
        dimension_semantics=dim_sem, vmem_limit_bytes=vmem_limit)

    if tc == C:
        kernel = functools.partial(
            _align_kl_kernel, inv_t=1.0 / T, batch=B, tile_rows=tb,
            tiles_per_core=tiles_per_core, num_row_tiles=num_row_tiles,
            has_row_pad=has_row_pad)

        def in_map(c, i):
            t = c * tiles_per_core + i
            return (jnp.minimum(t, num_row_tiles - 1), 0)   # clamp phantom tiles

        partials = pl.pallas_call(
            kernel,
            out_shape=jax.ShapeDtypeStruct((nc * 8, 128), jnp.float32),
            grid=(nc, tiles_per_core),
            in_specs=[pl.BlockSpec((tb, C), in_map),
                      pl.BlockSpec((tb, C), in_map)],
            out_specs=pl.BlockSpec((8, 128), lambda c, i: (c, 0)),
            compiler_params=compiler_params,
        )(logits1, logits2)
    else:
        num_col_tiles = -(-C // tc)
        has_col_pad = (num_col_tiles * tc) != C
        kernel = functools.partial(
            _align_kl_kernel_ct, inv_t=1.0 / T, batch=B, classes=C,
            tile_rows=tb, tile_cols=tc, tiles_per_core=tiles_per_core,
            has_row_pad=has_row_pad, has_col_pad=has_col_pad)

        def in_map(c, i, j):
            t = c * tiles_per_core + i
            return (jnp.minimum(t, num_row_tiles - 1), j)

        partials = pl.pallas_call(
            kernel,
            out_shape=jax.ShapeDtypeStruct((nc * 8, 128), jnp.float32),
            grid=(nc, tiles_per_core, num_col_tiles),
            in_specs=[pl.BlockSpec((tb, tc), in_map),
                      pl.BlockSpec((tb, tc), in_map)],
            out_specs=pl.BlockSpec((8, 128), lambda c, i, j: (c, 0)),
            scratch_shapes=[pltpu.VMEM((tb, 1), jnp.float32)] * 5,
            compiler_params=compiler_params,
        )(logits1, logits2)

    # Each per-core (8,128) block holds that core's partial sum broadcast;
    # take one element per core and finish 'batchmean' + T**2 scaling in XLA.
    return jnp.sum(partials[0::8, 0]) * (T * T / B)


# --------------------------------------------------------------------------
# Pure-JAX reference and self-test
# --------------------------------------------------------------------------
def _reference(logits1, logits2, temperature=1.0):
    T = temperature
    log_p1 = jax.nn.log_softmax(logits1 / T, axis=-1)
    p2 = jax.nn.softmax(logits2 / T, axis=-1)
    log_p2 = jax.nn.log_softmax(logits2 / T, axis=-1)
    kl = jnp.sum(p2 * (log_p2 - log_p1)) / logits1.shape[0]
    return kl * T**2


if __name__ == "__main__":
    key = jax.random.PRNGKey(0)

    def check(name, B, C, dtype, temperature, block_rows=None, block_cols=None):
        k1, k2 = jax.random.split(jax.random.fold_in(key, B * 131 + C), 2)
        l1 = jax.random.normal(k1, (B, C), dtype=jnp.float32).astype(dtype)
        l2 = jax.random.normal(k2, (B, C), dtype=jnp.float32).astype(dtype)
        out = align_kl_loss(l1, l2, temperature=temperature,
                            block_rows=block_rows, block_cols=block_cols)
        out = jax.block_until_ready(out)
        ref = _reference(l1.astype(jnp.float32), l2.astype(jnp.float32), temperature)
        assert jnp.allclose(out, ref, atol=1e-5, rtol=1e-4), (name, out, ref)

    # Small demo shape consistent with (B, C) classifier logits: single block.
    check("single-tile", 8, 32, jnp.float32, 2.0)
    # Odd tile count: 2-core shard with a phantom tile + partial (masked) last tile.
    check("partial+phantom", 40, 256, jnp.float32, 2.0, block_rows=16)
    # Even tile count, no padding -> unmasked fast accumulation path.
    check("even-2core", 64, 256, jnp.float32, 1.5, block_rows=16)
    # bf16 inputs read from HBM, f32 math inside the kernel.
    check("bf16", 32, 128, jnp.bfloat16, 2.0, block_rows=16)
    # Class-tiled (online LSE) path with a partial last row tile.
    check("class-tiled", 24, 512, jnp.float32, 2.0, block_rows=16, block_cols=128)
    # Class-tiled path with a partial last class chunk and T == 1 (inv_t skipped).
    check("class-tiled-colpad", 16, 384, jnp.float32, 1.0, block_cols=256)

    print("KERNEL_OK")
</pallas_src>

<mosaic_0001>
module attributes {stable_mosaic.version = 11 : i64} {
  func.func @_align_kl_kernel(%arg0: i32, %arg1: i32, %arg2: memref<8x32xf32, #tpu.memory_space<vmem>>, %arg3: memref<8x32xf32, #tpu.memory_space<vmem>>, %arg4: memref<8x128xf32, #tpu.memory_space<vmem>>) attributes {dimension_semantics = [#tpu.dimension_semantics<parallel>, #tpu.dimension_semantics<arbitrary>], iteration_bounds = array<i64: 1, 1>, scalar_prefetch = 0 : i64, scratch_operands = 0 : i64, tpu.core_type = #tpu.core_type<tc>, window_params = [{transform_indices = @transform_0, window_bounds = array<i64: 8, 32>}, {transform_indices = @transform_1, window_bounds = array<i64: 8, 32>}, {transform_indices = @transform_2, window_bounds = array<i64: 8, 128>}]} {
    %c0_i32 = arith.constant 0 : i32
    %0 = arith.cmpi eq, %arg1, %c0_i32 : i32
    %1 = arith.extui %0 : i1 to i32
    %c0_i32_0 = arith.constant 0 : i32
    %2 = arith.cmpi ne, %1, %c0_i32_0 : i32
    scf.if %2 {
      %cst_15 = arith.constant 0.000000e+00 : f32
      %43 = vector.broadcast %cst_15 : f32 to vector<8x128xf32>
      %c0_16 = arith.constant 0 : index
      %c0_17 = arith.constant 0 : index
      %44 = vector.load %arg4[%c0_16, %c0_17] : memref<8x128xf32, #tpu.memory_space<vmem>>, vector<8x128xf32>
      tpu.vector_store %arg4[%c0_16, %c0_17], %43 {strides = array<i32>} : memref<8x128xf32, #tpu.memory_space<vmem>>, vector<8x128xf32>,
    } else {
    }
    %c0 = arith.constant 0 : index
    %c0_1 = arith.constant 0 : index
    %3 = vector.load %arg2[%c0, %c0_1] : memref<8x32xf32, #tpu.memory_space<vmem>>, vector<8x32xf32>
    %c0_2 = arith.constant 0 : index
    %c0_3 = arith.constant 0 : index
    %4 = vector.load %arg3[%c0_2, %c0_3] : memref<8x32xf32, #tpu.memory_space<vmem>>, vector<8x32xf32>
    %cst = arith.constant 5.000000e-01 : f32
    %5 = vector.broadcast %cst : f32 to vector<8x32xf32>
    %6 = arith.mulf %3, %5 : vector<8x32xf32>
    %cst_4 = arith.constant 5.000000e-01 : f32
    %7 = vector.broadcast %cst_4 : f32 to vector<8x32xf32>
    %8 = arith.mulf %4, %7 : vector<8x32xf32>
    %cst_5 = arith.constant dense<0xFF800000> : vector<8xf32>
    %9 = vector.multi_reduction <maximumf>, %6, %cst_5 [1] : vector<8x32xf32> to vector<8xf32>
    %10 = vector.shape_cast %9 : vector<8xf32> to vector<8x1xf32>
    %cst_6 = arith.constant dense<0xFF800000> : vector<8xf32>
    %11 = vector.multi_reduction <maximumf>, %8, %cst_6 [1] : vector<8x32xf32> to vector<8xf32>
    %12 = vector.shape_cast %11 : vector<8xf32> to vector<8x1xf32>
    %13 = arith.subf %8, %6 : vector<8x32xf32>
    %14 = arith.subf %10, %12 : vector<8x1xf32>
    %15 = vector.broadcast %14 : vector<8x1xf32> to vector<8x32xf32>
    %16 = arith.addf %13, %15 : vector<8x32xf32>
    %17 = vector.broadcast %10 : vector<8x1xf32> to vector<8x32xf32>
    %18 = arith.subf %6, %17 : vector<8x32xf32>
    %19 = math.exp %18 : vector<8x32xf32>
    %cst_7 = arith.constant dense<0.000000e+00> : vector<8xf32>
    %20 = vector.multi_reduction <add>, %19, %cst_7 [1] : vector<8x32xf32> to vector<8xf32>
    %21 = vector.shape_cast %20 : vector<8xf32> to vector<8x1xf32>
    %22 = vector.broadcast %12 : vector<8x1xf32> to vector<8x32xf32>
    %23 = arith.subf %8, %22 : vector<8x32xf32>
    %24 = math.exp %23 : vector<8x32xf32>
    %cst_8 = arith.constant dense<0.000000e+00> : vector<8xf32>
    %25 = vector.multi_reduction <add>, %24, %cst_8 [1] : vector<8x32xf32> to vector<8xf32>
    %26 = vector.shape_cast %25 : vector<8xf32> to vector<8x1xf32>
    %27 = arith.mulf %24, %16 : vector<8x32xf32>
    %cst_9 = arith.constant dense<0.000000e+00> : vector<8xf32>
    %28 = vector.multi_reduction <add>, %27, %cst_9 [1] : vector<8x32xf32> to vector<8xf32>
    %29 = vector.shape_cast %28 : vector<8xf32> to vector<8x1xf32>
    %30 = arith.divf %29, %26 : vector<8x1xf32>
    %31 = math.log %21 : vector<8x1xf32>
    %32 = math.log %26 : vector<8x1xf32>
    %33 = arith.subf %31, %32 : vector<8x1xf32>
    %34 = arith.addf %30, %33 : vector<8x1xf32>
    %c0_10 = arith.constant 0 : index
    %c0_11 = arith.constant 0 : index
    %35 = vector.load %arg4[%c0_10, %c0_11] : memref<8x128xf32, #tpu.memory_space<vmem>>, vector<8x128xf32>
    %36 = vector.shape_cast %34 : vector<8x1xf32> to vector<1x8x1xf32>
    %cst_12 = arith.constant dense<0.000000e+00> : vector<1xf32>
    %37 = vector.multi_reduction <add>, %36, %cst_12 [1, 2] : vector<1x8x1xf32> to vector<1xf32>
    %38 = vector.shape_cast %37 : vector<1xf32> to vector<1x1x1xf32>
    %39 = vector.extract %38[0, 0, 0] : f32 from vector<1x1x1xf32>
    %40 = vector.broadcast %39 : f32 to vector<8x128xf32>
    %41 = arith.addf %35, %40 : vector<8x128xf32>
    %c0_13 = arith.constant 0 : index
    %c0_14 = arith.constant 0 : index
    %42 = vector.load %arg4[%c0_13, %c0_14] : memref<8x128xf32, #tpu.memory_space<vmem>>, vector<8x128xf32>
    tpu.vector_store %arg4[%c0_13, %c0_14], %41 {strides = array<i32>} : memref<8x128xf32, #tpu.memory_space<vmem>>, vector<8x128xf32>,
    return
  }
  func.func @transform_0(%arg0: i32, %arg1: i32) -> (i32, i32) {
    %c1_i32 = arith.constant 1 : i32
    %0 = arith.muli %arg0, %c1_i32 : i32
    %1 = arith.addi %0, %arg1 : i32
    %c0_i32 = arith.constant 0 : i32
    %2 = arith.minsi %1, %c0_i32 : i32
    %c0_i32_0 = arith.constant 0 : i32
    %c0_i32_1 = arith.constant 0 : i32
    return %2, %c0_i32_0 : i32, i32
  }
  func.func @transform_1(%arg0: i32, %arg1: i32) -> (i32, i32) {
    %c1_i32 = arith.constant 1 : i32
    %0 = arith.muli %arg0, %c1_i32 : i32
    %1 = arith.addi %0, %arg1 : i32
    %c0_i32 = arith.constant 0 : i32
    %2 = arith.minsi %1, %c0_i32 : i32
    %c0_i32_0 = arith.constant 0 : i32
    %c0_i32_1 = arith.constant 0 : i32
    return %2, %c0_i32_0 : i32, i32
  }
  func.func @transform_2(%arg0: i32, %arg1: i32) -> (i32, i32) {
    %c0_i32 = arith.constant 0 : i32
    %c0_i32_0 = arith.constant 0 : i32
    return %arg0, %c0_i32 : i32, i32
  }
}

</mosaic_0001>

<bundles_post_ra>
// kernel: tpu_custom_call.1
= control target key start
LH: loop header
LB: loop body
LE: loop exit
PB: predicated region body
PF: predicated region fallthrough
CT: control target
= control target key end

     0   :  { %7 = vsyncpa [#allocation3], 0  ;;  %s277_s0 = inlined_call_operand.hbm [shape: f32[8,32], index: 0, kind: input, shape index: {}]   ;;  %s278_s1 = inlined_call_operand.hbm [shape: f32[8,32], index: 1, kind: input, shape index: {}]   ;;  %s279_s2 = inlined_call_operand.hbm [shape: f32[8,128], index: 2, kind: output, shape index: {}]  }
   0x1   :  { %8 = vsyncpa [#allocation6], 0 }
   0x2   :  { %9 = vsyncpa [#allocation4], 0  ;;  %s218_s9 = smov [#allocation2]   ;;  %s219_s11 = smov [#allocation5]  }
   0x3   :  { %s21_s10 = sshll.u32 %s218_s9, 4  ;;  %s36_s12 = sshll.u32 %s219_s11, 4  ;;  %s22_s10 = int_to_ptr.vmem [resolvable:$true] %s21_s10  ;;  %s37_s12 = int_to_ptr.vmem [resolvable:$true] %s36_s12 }
   0x4   :  { %s146_s15 = scalar_lea.hbm %s277_s0, 128 }
   0x5   :  { %p147_p0 = scmp.ne.s32.totalorder %s277_s0, %s146_s15  ;;  %p150_p1 = scmp.lt.u32.totalorder %s146_s15, %s277_s0 }
   0x7   :  { %p152_p2 = pnand %p150_p1, %p147_p0 }
   0x9   :  { %155 = shalt.err (!%p152_p2)
}
   0xa   :  { %s156_s20 = scalar_lea.vmem %s22_s10, 128  ;;  %p161_p4 = scmp.lt.s32.totalorder %s22_s10, %s22_s10 }
   0xb   :  { %p157_p3 = scmp.ne.s32.totalorder %s22_s10, %s156_s20  ;;  %p162_p5 = scmp.lt.s32.totalorder %s156_s20, %s156_s20 }
   0xd   :  { %p163_p6 = por %p162_p5, %p161_p4 }
   0xf   :  { %p164_p7 = pnand %p163_p6, %p157_p3 }
  0x11   :  { %167 = shalt.err (!%p164_p7)
}
  0x12   :  { %24 = dma.hbm_to_vmem [thread:$0]  %s277_s0, 128, %s22_s10, [#allocation3]  }
  0x13   :  { %s168_s25 = scalar_lea.hbm %s278_s1, 128 }
  0x14   :  { %p169_p8 = scmp.ne.s32.totalorder %s278_s1, %s168_s25  ;;  %p172_p9 = scmp.lt.u32.totalorder %s168_s25, %s278_s1 }
  0x16   :  { %p174_p10 = pnand %p172_p9, %p169_p8 }
  0x18   :  { %177 = shalt.err (!%p174_p10)
}
  0x19   :  { %s178_s30 = scalar_lea.vmem %s37_s12, 128  ;;  %p183_p12 = scmp.lt.s32.totalorder %s37_s12, %s37_s12 }
  0x1a   :  { %p179_p11 = scmp.ne.s32.totalorder %s37_s12, %s178_s30  ;;  %p184_p13 = scmp.lt.s32.totalorder %s178_s30, %s178_s30 }
  0x1c   :  { %p185_p0 = por %p184_p13, %p183_p12 }
  0x1e   :  { %p186_p1 = pnand %p185_p0, %p179_p11 }
  0x20   :  { %189 = shalt.err (!%p186_p1)
}
  0x21   :  { %39 = dma.hbm_to_vmem [thread:$0]  %s278_s1, 128, %s37_s12, [#allocation6]  }
  0x22   :  { %212 = dma.done.wait [#allocation3], 128  }
  0x23   :  { %213 = vsyncadd [#allocation3], 4294967168 }
  0x24   :  { %214 = dma.done.wait [#allocation6], 128  }
  0x25   :  { %215 = vsyncadd [#allocation6], 4294967168  ;;  %v57_v0 = vld [vmem:[#allocation2] sm:$0xff]  ;;  %vm61_vm0 = vcmask 261120   ;;  %v58_v1 = vld [vmem:[#allocation5] sm:$0xff]  ;;  %vm96_vm1 = vcmask 7168  }
  0x26   :  { %v59_v2 = vmul.f32 0.5, %v57_v0  ;;  %v60_v3 = vmul.f32 0.5, %v58_v1  ;;  %s220_s1 = smov [#allocation7]  }
  0x27   :  { %s116_s4 = sshll.u32 %s220_s1, 4  ;;  %s117_s4 = int_to_ptr.vmem [resolvable:$true] %s116_s4 }
  0x28   :  { %v62_v4 = vsel %vm61_vm0, %v59_v2, -inf  ;;  %v65_v5 = vsel %vm61_vm0, %v60_v3, -inf  ;;  %v68_v12 = vsub.f32 %v60_v3, %v59_v2  ;;  %s190_s6 = scalar_lea.vmem %s117_s4, 128  ;;  %p195_p3 = scmp.lt.s32.totalorder %s117_s4, %s117_s4 }
  0x29   :  { %63 = vmax.xlane.f32.xlu0 %v62_v4  ;;  %p191_p2 = scmp.ne.s32.totalorder %s117_s4, %s190_s6  ;;  %p196_p4 = scmp.lt.s32.totalorder %s190_s6, %s190_s6 }
  0x2b   :  { %p197_p5 = por %p196_p4, %p195_p3 }
  0x2d   :  { %66 = vmax.xlane.f32.xlu0 %v65_v5  ;;  %p198_p6 = pnand %p197_p5, %p191_p2 }
  0xb6   :  { %v64_v6 = vpop.xlane.xlu0 %63 }
  0xb7   :  { %v71_v7 = vsub.f32 %v59_v2, %v64_v6 }
  0xb9   :  { %v72_v8 = vmul.f32 1.442695, %v71_v7 }
  0xba   :  { %v67_v9 = vpop.xlane.xlu0 %66 }
  0xbb   :  { %136 = vpow2.f32 %v72_v8  ;;  %v77_v10 = vsub.f32 %v60_v3, %v67_v9  ;;  %v69_v13 = vsub.f32 %v64_v6, %v67_v9 }
  0xbd   :  { %v78_v11 = vmul.f32 1.442695, %v77_v10  ;;  %v70_v16 = vadd.f32 %v69_v13, %v68_v12 }
  0xbf   :  { %138 = vpow2.f32 %v78_v11 }
  0xc5   :  { %v137_v14 = vpop.eup %136 }
  0xc6   :  { %v74_v15 = vsel %vm61_vm0, %v137_v14, 0.0 }
  0xc7   :  { %75 = vadd.xlane.f32.xlu1 %v74_v15 }
  0xc9   :  { %v139_v17 = vpop.eup %138 }
  0xca   :  { %v80_v18 = vsel %vm61_vm0, %v139_v17, 0.0  ;;  %v83_v19 = vmul.f32 %v139_v17, %v70_v16 }
  0xcb   :  { %81 = vadd.xlane.f32.xlu1 %v80_v18 }
  0xcc   :  { %v84_v20 = vsel %vm61_vm0, %v83_v19, 0.0 }
  0xcd   :  { %85 = vadd.xlane.f32.xlu0 %v84_v20 }
 0x154   :  { %v76_v21 = vpop.xlane.xlu1 %75 }
 0x155   :  { %140 = vlog2.f32 %v76_v21 }
 0x158   :  { %v82_v22 = vpop.xlane.xlu1 %81 }
 0x159   :  { %142 = vrcp.f32 %v82_v22 }
 0x15a   :  { %144 = vlog2.f32 %v82_v22  ;;  %v86_v28 = vpop.xlane.xlu0 %85 }
 0x15f   :  { %v141_v23 = vpop.eup %140 }
 0x160   :  { %v90_v26 = vmul.f32 0.6931472, %v141_v23 }
 0x163   :  { %v143_v24 = vpop.eup %142 }
 0x164   :  { %v145_v25 = vpop.eup %144  ;;  %v88_v29 = vmul.f32 %v143_v24, %v86_v28 }
 0x165   :  { %v92_v27 = vmul.f32 0.6931472, %v145_v25 }
 0x167   :  { %v93_v30 = vsub.f32 %v90_v26, %v92_v27 }
 0x169   :  { %v94_v31 = vadd.f32 %v93_v30, %v88_v29 }
 0x16b   :  { %v97_v32 = vsel %vm96_vm1, %v94_v31, 0.0 }
 0x16c   :  { %98 = vadd.xlane.f32.xlu1 %v97_v32 }
 0x1f9   :  { %v99_v33 = vpop.xlane.xlu1 %98 }
 0x1fa   :  { %v100_v34 = vrot.slane %v99_v33, 4 }
 0x1fc   :  { %v101_v35 = vadd.f32 %v100_v34, %v99_v33 }
 0x1fe   :  { %v102_v36 = vrot.slane %v101_v35, 2 }
 0x200   :  { %v103_v37 = vadd.f32 %v102_v36, %v101_v35 }
 0x202   :  { %v104_v38 = vrot.slane %v103_v37, 1 }
 0x204   :  { %v105_v39 = vadd.f32 %v104_v38, %v103_v37 }
 0x206   :  { %130 = vpush %v105_v39 }
 0x237   :  { %s131_s5 = spop %130 }
 0x238   :  { %v107_v40 = vstv %s131_s5 }
 0x239   :  { %109 = vst [vmem:[#allocation7] sm:$0xff] %v107_v40 }
 0x23a   :  { %201 = shalt.err (!%p198_p6)
}
 0x23b   :  { %s202_s9 = scalar_lea.hbm %s279_s2, 128 }
 0x23c   :  { %p203_p7 = scmp.ne.s32.totalorder %s279_s2, %s202_s9  ;;  %p206_p8 = scmp.lt.u32.totalorder %s202_s9, %s279_s2 }
 0x23e   :  { %p208_p9 = pnand %p206_p8, %p203_p7 }
 0x240   :  { %211 = shalt.err (!%p208_p9)
}
 0x241   :  { %119 = dma.vmem_to_hbm [thread:$0]  %s117_s4, 128, %s279_s2, [#allocation4]  }
 0x242   :  { %216 = dma.done.wait [#allocation4], 128  }
 0x243   :  { %217 = vsyncadd [#allocation4], 4294967168 }
 0x244   :  { %123 = vsyncpa [#allocation3], 1 }
 0x245   :  { %124 = vsyncpa [#allocation6], 1 }
 0x246   :  { %125 = vsyncpa [#allocation4], 1 }

</bundles_post_ra>
